<compile_context>
chip_gen: v7x
topology: tpu7x:2x2x1
jax: 0.10.0
libtpu: 0.0.40
codegen_flags: <defaults>
</compile_context>

<pallas_src>
import functools

import jax
import jax.numpy as jnp
from jax import lax
from jax.experimental import pallas as pl
from jax.experimental.pallas import tpu as pltpu

_INV_SQRT2 = 0.7071067811865476
_SQRT_2_OVER_PI = 0.7978845608028654


# ---------------------------------------------------------------------------
# Chip introspection (best effort, safe fallbacks).
# ---------------------------------------------------------------------------
def _chip_kind() -> str:
    try:
        return jax.devices()[0].device_kind.lower()
    except Exception:
        return ""


def _is_v7x() -> bool:
    k = _chip_kind()
    return ("7x" in k) or ("v7" in k) or k.startswith("tpu7")


def _num_tensorcores() -> int:
    # v7x exposes 2 TensorCores per chip; earlier generations 1 per JAX device.
    return 2 if _is_v7x() else 1


def _physical_vmem_bytes() -> int:
    try:
        return int(pltpu.get_tpu_info().vmem_capacity_bytes)
    except Exception:
        pass
    if _is_v7x():
        return 64 << 20
    if _chip_kind():
        return 128 << 20          # v4 / v5e / v5p / v6e
    return 64 << 20               # unknown backend: be conservative


def _vmem_budget_bytes() -> int:
    # Leave ~22% headroom for Mosaic internals / semaphores / misc buffers.
    return int(_physical_vmem_bytes() * 0.78)


def _mxu_prefers_256() -> bool:
    k = _chip_kind()
    return ("v6" in k) or _is_v7x()


def _round_up(x: int, m: int) -> int:
    return (x + m - 1) // m * m


def _pad_dim(d: int, prefer_256: bool) -> int:
    p128 = _round_up(d, 128)
    if prefer_256:
        p256 = _round_up(d, 256)
        if p256 * 8 <= p128 * 9:      # <= 12.5% extra padding => "cheap"
            return p256
    return p128


# ---------------------------------------------------------------------------
# Kernels.
# ---------------------------------------------------------------------------
def _gelu_f32(h, approximate: bool):
    if approximate:
        # tanh approximation -> EUP (free VLIW slot); ~1e-3 off nn.GELU().
        return 0.5 * h * (1.0 + jnp.tanh(_SQRT_2_OVER_PI *
                                         (h + 0.044715 * h * h * h)))
    # exact erf GELU == PyTorch nn.GELU default.
    return 0.5 * h * (1.0 + lax.erf(h * _INV_SQRT2))


def _mlp_kernel_resident(x_ref, w1_ref, b1_ref, w2_ref, b2_ref, o_ref, *,
                         approximate: bool):
    # Weight-resident path: grid = (M tiles,); whole w1/w2 live in VMEM.
    h = jnp.dot(x_ref[...], w1_ref[...], preferred_element_type=jnp.float32)
    h = _gelu_f32(h + b1_ref[...].astype(jnp.float32), approximate)
    out = jnp.dot(h.astype(w2_ref.dtype), w2_ref[...],
                  preferred_element_type=jnp.float32)
    o_ref[...] = (out + b2_ref[...].astype(jnp.float32)).astype(o_ref.dtype)


def _mlp_kernel_htiled(x_ref, w1_ref, b1_ref, w2_ref, b2_ref, o_ref, acc_ref,
                       *, approximate: bool):
    # grid = (M tiles, H tiles); H axis is last / "arbitrary" (lin2 reduction).
    hj = pl.program_id(1)

    @pl.when(hj == 0)
    def _():
        acc_ref[...] = jnp.zeros_like(acc_ref)

    h = jnp.dot(x_ref[...], w1_ref[...], preferred_element_type=jnp.float32)
    h = _gelu_f32(h + b1_ref[...].astype(jnp.float32), approximate)
    acc_ref[...] += jnp.dot(h.astype(w2_ref.dtype), w2_ref[...],
                            preferred_element_type=jnp.float32)

    @pl.when(hj == pl.num_programs(1) - 1)
    def _():
        o_ref[...] = (acc_ref[...] +
                      b2_ref[...].astype(jnp.float32)).astype(o_ref.dtype)


# ---------------------------------------------------------------------------
# VMEM footprint models (include the in-kernel `h` temporaries).
# ---------------------------------------------------------------------------
def _resident_footprint(tm, Dp, Hp, isz):
    return (4 * tm * Dp * isz                 # x + out, double buffered
            + 2 * 2 * Dp * Hp * isz           # w1 + w2 (counted x2 = safe)
            + 2 * (Hp + Dp) * isz             # biases
            + tm * Hp * (4 + isz))            # h (f32) + dtype-cast copy


def _htile_footprint(tm, th, Dp, isz):
    return (4 * tm * Dp * isz                 # x + out, double buffered
            + 2 * 2 * Dp * th * isz           # w1 + w2 H-slabs, double buffered
            + 2 * (th + Dp) * isz             # biases
            + tm * Dp * 4                     # f32 accumulator scratch
            + tm * th * (4 + isz))            # h (f32) + dtype-cast copy


def _pick_hidden_tiling(M, Dp, Hp, isz, tm, th, align, vmem_cap):
    """Pick (tm, th, n_h_tiles) for the H-tiled path: th near-divisor of Hp,
    shrink th then tm until the footprint fits the per-chip VMEM budget."""
    tm_e = min(tm, _round_up(M, 8))
    th_req = min(th, Hp)
    while True:
        nt = max(1, -(-Hp // th_req))
        th_e = _round_up(-(-Hp // nt), align)
        if _htile_footprint(tm_e, th_e, Dp, isz) <= vmem_cap:
            return tm_e, th_e, nt
        if th_e > align:
            th_req = max(align, th_e // 2)
        elif tm_e > 8:
            tm_e = max(8, _round_up(tm_e // 2, 8))
        else:
            return tm_e, th_e, nt   # smallest tiles; let the compiler try


# ---------------------------------------------------------------------------
# Forward on pre-padded parameters.
# ---------------------------------------------------------------------------
@functools.partial(jax.jit, static_argnames=("D", "tm", "th", "approximate"))
def _mlp_forward_padded(x, w1_p, b1_p, w2_p, b2_p, *, D, tm, th, approximate):
    orig_shape = x.shape
    assert orig_shape[-1] == D, "trailing dim of x must be embedding_dim"
    Dp, Hp = w1_p.shape
    dt = x.dtype
    isz = jnp.dtype(dt).itemsize

    x2 = x.reshape(-1, D)
    M = x2.shape[0]

    vmem_cap = _vmem_budget_bytes()
    num_tc = _num_tensorcores()
    align = 256 if (Hp % 256 == 0 and _mxu_prefers_256()) else 128

    # Token tile: as big as requested (default 512), never bigger than the
    # sublane-rounded M; split into >=2 "parallel" tiles on 2-TC chips (v7x).
    tm_eff = min(tm, _round_up(M, 8))
    if num_tc >= 2 and M >= 16 and _round_up(M, tm_eff) // tm_eff < 2:
        tm_eff = _round_up(-(-M // 2), 8)

    kernel_kw = dict(approximate=approximate)

    if _resident_footprint(tm_eff, Dp, Hp, isz) <= vmem_cap:
        # ---------- weight-resident fast path: weights fetched exactly once --
        Mp = _round_up(M, tm_eff)
        if (Mp, Dp) != (M, D):
            x2 = jnp.pad(x2, ((0, Mp - M), (0, Dp - D)))
        fp = _resident_footprint(tm_eff, Dp, Hp, isz)
        vmem_limit = min(vmem_cap, max(32 << 20, int(fp * 5 // 4) + (4 << 20)))
        cost = pl.CostEstimate(
            flops=int(4 * Mp * Dp * Hp),
            transcendentals=int(Mp * Hp),
            bytes_accessed=int((2 * Mp * Dp + 2 * Dp * Hp + Hp + Dp) * isz),
        )
        out_p = pl.pallas_call(
            functools.partial(_mlp_kernel_resident, **kernel_kw),
            out_shape=jax.ShapeDtypeStruct((Mp, Dp), dt),
            grid_spec=pltpu.PrefetchScalarGridSpec(
                num_scalar_prefetch=0,
                grid=(Mp // tm_eff,),
                in_specs=[
                    pl.BlockSpec((tm_eff, Dp), lambda i: (i, 0)),   # x tile
                    pl.BlockSpec((Dp, Hp), lambda i: (0, 0)),       # w1 resident
                    pl.BlockSpec((1, Hp), lambda i: (0, 0)),        # b1 resident
                    pl.BlockSpec((Hp, Dp), lambda i: (0, 0)),       # w2 resident
                    pl.BlockSpec((1, Dp), lambda i: (0, 0)),        # b2 resident
                ],
                out_specs=pl.BlockSpec((tm_eff, Dp), lambda i: (i, 0)),
            ),
            compiler_params=pltpu.CompilerParams(
                dimension_semantics=("parallel",),
                vmem_limit_bytes=vmem_limit,
            ),
            cost_estimate=cost,
        )(x2, w1_p, b1_p, w2_p, b2_p)
    else:
        # ---------- H-tiled path: stream hidden slabs, accumulate lin2 -------
        tm_eff, th_eff, nt = _pick_hidden_tiling(M, Dp, Hp, isz, tm_eff, th,
                                                 align, vmem_cap)
        Mp = _round_up(M, tm_eff)
        Hp_g = nt * th_eff
        if (Mp, Dp) != (M, D):
            x2 = jnp.pad(x2, ((0, Mp - M), (0, Dp - D)))
        if Hp_g != Hp:
            # Rare (th not a near-divisor of Hp): extra zero hidden columns
            # are mathematically inert.
            w1_p = jnp.pad(w1_p, ((0, 0), (0, Hp_g - Hp)))
            b1_p = jnp.pad(b1_p, ((0, 0), (0, Hp_g - Hp)))
            w2_p = jnp.pad(w2_p, ((0, Hp_g - Hp), (0, 0)))
        fp = _htile_footprint(tm_eff, th_eff, Dp, isz)
        vmem_limit = min(vmem_cap, max(32 << 20, int(fp * 5 // 4) + (4 << 20)))
        n_m_tiles = Mp // tm_eff
        cost = pl.CostEstimate(
            flops=int(4 * Mp * Dp * Hp_g),
            transcendentals=int(Mp * Hp_g),
            # weights (and b1) are re-streamed once per M tile
            bytes_accessed=int((2 * Mp * Dp
                                + n_m_tiles * (2 * Dp * Hp_g + Hp_g + Dp))
                               * isz),
        )
        out_p = pl.pallas_call(
            functools.partial(_mlp_kernel_htiled, **kernel_kw),
            out_shape=jax.ShapeDtypeStruct((Mp, Dp), dt),
            grid_spec=pltpu.PrefetchScalarGridSpec(
                num_scalar_prefetch=0,
                grid=(n_m_tiles, nt),
                in_specs=[
                    pl.BlockSpec((tm_eff, Dp), lambda i, j: (i, 0)),   # x tile
                    pl.BlockSpec((Dp, th_eff), lambda i, j: (0, j)),   # w1 slab
                    pl.BlockSpec((1, th_eff), lambda i, j: (0, j)),    # b1 slab
                    pl.BlockSpec((th_eff, Dp), lambda i, j: (j, 0)),   # w2 slab
                    pl.BlockSpec((1, Dp), lambda i, j: (0, 0)),        # b2
                ],
                out_specs=pl.BlockSpec((tm_eff, Dp), lambda i, j: (i, 0)),
                scratch_shapes=[pltpu.VMEM((tm_eff, Dp), jnp.float32)],
            ),
            compiler_params=pltpu.CompilerParams(
                dimension_semantics=("parallel", "arbitrary"),
                vmem_limit_bytes=vmem_limit,
            ),
            cost_estimate=cost,
        )(x2, w1_p, b1_p, w2_p, b2_p)

    out = out_p
    if (out_p.shape[0], out_p.shape[1]) != (M, D):
        out = out_p[:M, :D]
    return out.reshape(orig_shape)


# ---------------------------------------------------------------------------
# Public API.
# ---------------------------------------------------------------------------
def prepare_mlp_params(w1, b1, w2, b2):
    """Pad Linear params once (host side) to lane/MXU-aligned shapes.
    Zero padding is mathematically inert and the output is sliced back."""
    D, H = w1.shape
    assert w2.shape == (H, D) and b1.shape == (H,) and b2.shape == (D,)
    prefer_256 = _mxu_prefers_256()
    Dp = _pad_dim(D, prefer_256)
    Hp = _pad_dim(H, prefer_256)
    w1_p = jnp.pad(w1, ((0, Dp - D), (0, Hp - H)))
    b1_p = jnp.pad(b1, (0, Hp - H)).reshape(1, Hp)
    w2_p = jnp.pad(w2, ((0, Hp - H), (0, Dp - D)))
    b2_p = jnp.pad(b2, (0, Dp - D)).reshape(1, Dp)
    return w1_p, b1_p, w2_p, b2_p


def make_mlp_block(w1, b1, w2, b2, *, tm=512, th=1024, approximate=False):
    """Pre-pads params ONCE and returns an `x -> out` closure (production
    path: weight padding is hoisted out of the per-call path)."""
    D = w1.shape[0]
    padded = prepare_mlp_params(w1, b1, w2, b2)

    def fwd(x):
        return _mlp_forward_padded(x, *padded, D=D, tm=tm, th=th,
                                   approximate=approximate)

    return fwd


def mlp_block(x, w1, b1, w2, b2, *, tm=512, th=1024, approximate=False):
    """One-shot convenience wrapper. x: [..., D]; w1: (D,H); b1: (H,);
    w2: (H,D); b2: (D,)."""
    return make_mlp_block(w1, b1, w2, b2, tm=tm, th=th,
                          approximate=approximate)(x)


def _reference(x, w1, b1, w2, b2):
    h = x @ w1 + b1
    h = 0.5 * h * (1.0 + lax.erf(h * _INV_SQRT2))
    return h @ w2 + b2


if __name__ == "__main__":
    # Small shapes consistent with the module: batch=2, seq=8,
    # embedding_dim=32, mlp_dim=64 -> x: [2, 8, 32].
    B, N, D, H = 2, 8, 32, 64

    key = jax.random.PRNGKey(0)
    kx, kw1, kb1, kw2, kb2 = jax.random.split(key, 5)

    x = jax.random.normal(kx, (B, N, D), dtype=jnp.float32)
    # Synthetic deterministic params (shapes match nn.Linear weights^T).
    w1 = jax.random.normal(kw1, (D, H), dtype=jnp.float32) * 0.05
    b1 = jax.random.normal(kb1, (H,), dtype=jnp.float32) * 0.05
    w2 = jax.random.normal(kw2, (H, D), dtype=jnp.float32) * 0.05
    b2 = jax.random.normal(kb2, (D,), dtype=jnp.float32) * 0.05

    ref = _reference(x.reshape(-1, D), w1, b1, w2, b2).reshape(B, N, D)

    # Production path: params padded once, closure reused.
    fwd = make_mlp_block(w1, b1, w2, b2)
    out = jax.block_until_ready(fwd(x))
    assert out.shape == (B, N, D)
    assert jnp.allclose(out, ref, atol=1e-4, rtol=1e-4), "mismatch vs reference"

    # One-shot wrapper hits the same kernel.
    out2 = jax.block_until_ready(mlp_block(x, w1, b1, w2, b2))
    assert jnp.allclose(out2, ref, atol=1e-4, rtol=1e-4), "mismatch vs reference"

    print("KERNEL_OK")
</pallas_src>

<mosaic_0001>
module attributes {stable_mosaic.version = 11 : i64} {
  func.func @_mlp_kernel_resident(%arg0: i32, %arg1: memref<16x128xf32, #tpu.memory_space<vmem>>, %arg2: memref<128x128xf32, #tpu.memory_space<vmem>>, %arg3: memref<1x128xf32, #tpu.memory_space<vmem>>, %arg4: memref<128x128xf32, #tpu.memory_space<vmem>>, %arg5: memref<1x128xf32, #tpu.memory_space<vmem>>, %arg6: memref<16x128xf32, #tpu.memory_space<vmem>>) attributes {dimension_semantics = [#tpu.dimension_semantics<parallel>], iteration_bounds = array<i64: 1>, scalar_prefetch = 0 : i64, scratch_operands = 0 : i64, tpu.core_type = #tpu.core_type<tc>, window_params = [{transform_indices = @transform_0, window_bounds = array<i64: 16, 128>}, {pipeline_mode = #tpu.pipeline_mode<synchronous>, transform_indices = @transform_1, window_bounds = array<i64: 128, 128>}, {pipeline_mode = #tpu.pipeline_mode<synchronous>, transform_indices = @transform_2, window_bounds = array<i64: 1, 128>}, {pipeline_mode = #tpu.pipeline_mode<synchronous>, transform_indices = @transform_3, window_bounds = array<i64: 128, 128>}, {pipeline_mode = #tpu.pipeline_mode<synchronous>, transform_indices = @transform_4, window_bounds = array<i64: 1, 128>}, {transform_indices = @transform_5, window_bounds = array<i64: 16, 128>}]} {
    %c0 = arith.constant 0 : index
    %c0_0 = arith.constant 0 : index
    %0 = vector.load %arg1[%c0, %c0_0] : memref<16x128xf32, #tpu.memory_space<vmem>>, vector<16x128xf32>
    %c0_1 = arith.constant 0 : index
    %c0_2 = arith.constant 0 : index
    %1 = vector.load %arg2[%c0_1, %c0_2] : memref<128x128xf32, #tpu.memory_space<vmem>>, vector<128x128xf32>
    %cst = arith.constant dense<0.000000e+00> : vector<16x128xf32>
    %2 = tpu.matmul %0, %1, %cst {dimension_numbers = #tpu.dot_dimension_numbers<[1], [0], [0], [1], [0, 0, 1, 1], [], []>} : vector<16x128xf32>, vector<128x128xf32>, vector<16x128xf32> -> vector<16x128xf32>
    %c0_3 = arith.constant 0 : index
    %c0_4 = arith.constant 0 : index
    %3 = vector.load %arg3[%c0_3, %c0_4] : memref<1x128xf32, #tpu.memory_space<vmem>>, vector<1x128xf32>
    %4 = vector.broadcast %3 : vector<1x128xf32> to vector<16x128xf32>
    %5 = arith.addf %2, %4 : vector<16x128xf32>
    %cst_5 = arith.constant 5.000000e-01 : f32
    %6 = vector.broadcast %cst_5 : f32 to vector<16x128xf32>
    %7 = arith.mulf %6, %5 : vector<16x128xf32>
    %cst_6 = arith.constant 0.707106769 : f32
    %8 = vector.broadcast %cst_6 : f32 to vector<16x128xf32>
    %9 = arith.mulf %5, %8 : vector<16x128xf32>
    %10 = math.erf %9 : vector<16x128xf32>
    %cst_7 = arith.constant 1.000000e+00 : f32
    %11 = vector.broadcast %cst_7 : f32 to vector<16x128xf32>
    %12 = arith.addf %11, %10 : vector<16x128xf32>
    %13 = arith.mulf %7, %12 : vector<16x128xf32>
    %c0_8 = arith.constant 0 : index
    %c0_9 = arith.constant 0 : index
    %14 = vector.load %arg4[%c0_8, %c0_9] : memref<128x128xf32, #tpu.memory_space<vmem>>, vector<128x128xf32>
    %cst_10 = arith.constant dense<0.000000e+00> : vector<16x128xf32>
    %15 = tpu.matmul %13, %14, %cst_10 {dimension_numbers = #tpu.dot_dimension_numbers<[1], [0], [0], [1], [0, 0, 1, 1], [], []>} : vector<16x128xf32>, vector<128x128xf32>, vector<16x128xf32> -> vector<16x128xf32>
    %c0_11 = arith.constant 0 : index
    %c0_12 = arith.constant 0 : index
    %16 = vector.load %arg5[%c0_11, %c0_12] : memref<1x128xf32, #tpu.memory_space<vmem>>, vector<1x128xf32>
    %17 = vector.broadcast %16 : vector<1x128xf32> to vector<16x128xf32>
    %18 = arith.addf %15, %17 : vector<16x128xf32>
    %c0_13 = arith.constant 0 : index
    %c0_14 = arith.constant 0 : index
    %19 = vector.load %arg6[%c0_13, %c0_14] : memref<16x128xf32, #tpu.memory_space<vmem>>, vector<16x128xf32>
    tpu.vector_store %arg6[%c0_13, %c0_14], %18 {strides = array<i32>} : memref<16x128xf32, #tpu.memory_space<vmem>>, vector<16x128xf32>,
    return
  }
  func.func @transform_0(%arg0: i32) -> (i32, i32) {
    %c0_i32 = arith.constant 0 : i32
    %c0_i32_0 = arith.constant 0 : i32
    return %arg0, %c0_i32 : i32, i32
  }
  func.func @transform_1(%arg0: i32) -> (i32, i32) {
    %c0_i32 = arith.constant 0 : i32
    %c0_i32_0 = arith.constant 0 : i32
    %c0_i32_1 = arith.constant 0 : i32
    return %c0_i32, %c0_i32_0 : i32, i32
  }
  func.func @transform_2(%arg0: i32) -> (i32, i32) {
    %c0_i32 = arith.constant 0 : i32
    %c0_i32_0 = arith.constant 0 : i32
    %c0_i32_1 = arith.constant 0 : i32
    return %c0_i32, %c0_i32_0 : i32, i32
  }
  func.func @transform_3(%arg0: i32) -> (i32, i32) {
    %c0_i32 = arith.constant 0 : i32
    %c0_i32_0 = arith.constant 0 : i32
    %c0_i32_1 = arith.constant 0 : i32
    return %c0_i32, %c0_i32_0 : i32, i32
  }
  func.func @transform_4(%arg0: i32) -> (i32, i32) {
    %c0_i32 = arith.constant 0 : i32
    %c0_i32_0 = arith.constant 0 : i32
    %c0_i32_1 = arith.constant 0 : i32
    return %c0_i32, %c0_i32_0 : i32, i32
  }
  func.func @transform_5(%arg0: i32) -> (i32, i32) {
    %c0_i32 = arith.constant 0 : i32
    %c0_i32_0 = arith.constant 0 : i32
    return %arg0, %c0_i32 : i32, i32
  }
}

</mosaic_0001>

<bundles_post_ra>
// kernel: _mlp_forward_padded.1
= control target key start
LH: loop header
LB: loop body
LE: loop exit
PB: predicated region body
PF: predicated region fallthrough
CT: control target
= control target key end

     0   :  { %10 = vsyncpa [#allocation3], 0  ;;  %s568_s0 = inlined_call_operand.vmem [shape: f32[16,128], index: 0, kind: input, shape index: {}]   ;;  %s569_s1 = inlined_call_operand.hbm [shape: f32[128,128], index: 1, kind: input, shape index: {}]   ;;  %s570_s2 = inlined_call_operand.vmem [shape: f32[1,128], index: 2, kind: input, shape index: {}]   ;;  %s571_s3 = inlined_call_operand.hbm [shape: f32[128,128], index: 3, kind: input, shape index: {}]   ;;  %s572_s4 = inlined_call_operand.vmem [shape: f32[1,128], index: 4, kind: input, shape index: {}]   ;;  %s573_s5 = inlined_call_operand.vmem [shape: f32[16,128], index: 5, kind: output, shape index: {}]  }
   0x1   :  { %11 = vsyncpa [#allocation5], 0  ;;  %s492_s18 = smov [#allocation2]   ;;  %s444_s22 = scalar_lea.hbm %s569_s1, 2048 }
   0x2   :  { %s19_s19 = sshll.u32 %s492_s18, 4  ;;  %p445_p0 = scmp.ne.s32.totalorder %s569_s1, %s444_s22  ;;  %s20_s19 = int_to_ptr.vmem [resolvable:$true] %s19_s19 }
   0x3   :  { %p448_p1 = scmp.lt.u32.totalorder %s444_s22, %s569_s1 }
   0x5   :  { %p450_p2 = pnand %p448_p1, %p445_p0 }
   0x7   :  { %453 = shalt.err (!%p450_p2)
}
   0x8   :  { %s454_s27 = scalar_lea.vmem %s20_s19, 2048  ;;  %p459_p4 = scmp.lt.s32.totalorder %s20_s19, %s20_s19 }
   0x9   :  { %p455_p3 = scmp.ne.s32.totalorder %s20_s19, %s454_s27  ;;  %p460_p5 = scmp.lt.s32.totalorder %s454_s27, %s454_s27 }
   0xb   :  { %p461_p6 = por %p460_p5, %p459_p4 }
   0xd   :  { %p462_p7 = pnand %p461_p6, %p455_p3 }
   0xf   :  { %465 = shalt.err (!%p462_p7)
}
  0x10   :  { %s493_s28 = smov 128   ;;  %s494_s29 = smov 8  }
  0x11   :  { %25 = dma.hbm_to_vmem [thread:$0]  %s569_s1, 2048, %s20_s19, [#allocation3], %s493_s28, %s493_s28, %s494_s29  }
  0x12   :  { %s495_s7 = smov [#allocation4]   ;;  %s466_s11 = scalar_lea.hbm %s571_s3, 2048 }
  0x13   :  { %s33_s8 = sshll.u32 %s495_s7, 4  ;;  %p467_p8 = scmp.ne.s32.totalorder %s571_s3, %s466_s11  ;;  %s34_s8 = int_to_ptr.vmem [resolvable:$true] %s33_s8 }
  0x14   :  { %p470_p9 = scmp.lt.u32.totalorder %s466_s11, %s571_s3 }
  0x16   :  { %p472_p10 = pnand %p470_p9, %p467_p8 }
  0x18   :  { %475 = shalt.err (!%p472_p10)
}
  0x19   :  { %s476_s16 = scalar_lea.vmem %s34_s8, 2048  ;;  %p481_p12 = scmp.lt.s32.totalorder %s34_s8, %s34_s8 }
  0x1a   :  { %p477_p11 = scmp.ne.s32.totalorder %s34_s8, %s476_s16  ;;  %p482_p13 = scmp.lt.s32.totalorder %s476_s16, %s476_s16 }
  0x1c   :  { %p483_p0 = por %p482_p13, %p481_p12 }
  0x1e   :  { %p484_p1 = pnand %p483_p0, %p477_p11 }
  0x20   :  { %487 = shalt.err (!%p484_p1)
}
  0x21   :  { %39 = dma.hbm_to_vmem [thread:$0]  %s571_s3, 2048, %s34_s8, [#allocation5], %s493_s28, %s493_s28, %s494_s29  }
  0x22   :  { %488 = dma.done.wait [#allocation3], 2048  }
  0x23   :  { %489 = vsyncadd [#allocation3], 4294965248 }
  0x24   :  { %490 = dma.done.wait [#allocation5], 2048  }
  0x25   :  { %491 = vsyncadd [#allocation5], 4294965248  ;;  %v50_v0 = vld [vmem:[#allocation2] sm:$0xff]  ;;  %v51_v1 = vld [vmem:[#allocation2 + $0x8] sm:$0xff] }
  0x26   :  { %v52_v2 = vld [vmem:[#allocation2 + $0x10] sm:$0xff]  ;;  %v372_v3 = vpack.c.bf16 %v51_v1, %v50_v0  ;;  %v53_v4 = vld [vmem:[#allocation2 + $0x18] sm:$0xff]  ;;  %v54_v6 = vld [vmem:[#allocation2 + $0x20] sm:$0xff] }
  0x27   :  { %v376_v5 = vpack.c.bf16 %v53_v4, %v52_v2  ;;  %v55_v7 = vld [vmem:[#allocation2 + $0x28] sm:$0xff]  ;;  %v56_v9 = vld [vmem:[#allocation2 + $0x30] sm:$0xff]  ;;  %v57_v10 = vld [vmem:[#allocation2 + $0x38] sm:$0xff] }
  0x28   :  { %373 = vmatprep.subr.bf16.mxu0 %v372_v3  ;;  %v380_v8 = vpack.c.bf16 %v55_v7, %v54_v6  ;;  %v48_v11 = vld [vmem:[%s568_s0] sm:$0xff]  ;;  %v159_v13 = vld [vmem:[#allocation4 + $0x8] sm:$0xff]  ;;  %v160_v14 = vld [vmem:[#allocation4 + $0x10] sm:$0xff]  ;;  %v384_v20 = vpack.c.bf16 %v57_v10, %v56_v9 }
  0x29   :  { %375 = vmatpush3.bf16.msra.mxu0 %v372_v3  ;;  %334 = vmatprep.mubr.f32.mxu0 %v48_v11  ;;  %v158_v12 = vld [vmem:[#allocation4] sm:$0xff]  ;;  %v161_v16 = vld [vmem:[#allocation4 + $0x18] sm:$0xff]  ;;  %v163_v19 = vld [vmem:[#allocation4 + $0x28] sm:$0xff] }
  0x2a   :  { %377 = vmatprep.subr.bf16.mxu0 %v376_v5  ;;  %v404_v15 = vpack.c.bf16 %v159_v13, %v158_v12  ;;  %v408_v17 = vpack.c.bf16 %v161_v16, %v160_v14  ;;  %v162_v18 = vld [vmem:[#allocation4 + $0x20] sm:$0xff]  ;;  %v59_v22 = vld [vmem:[#allocation2 + $0x48] sm:$0xff]  ;;  %v60_v25 = vld [vmem:[#allocation2 + $0x50] sm:$0xff] }
  0x2b   :  { %v58_v21 = vld [vmem:[#allocation2 + $0x40] sm:$0xff]  ;;  %v412_v23 = vpack.c.bf16 %v163_v19, %v162_v18  ;;  %v61_v26 = vld [vmem:[#allocation2 + $0x58] sm:$0xff]  ;;  %v63_v29 = vld [vmem:[#allocation2 + $0x68] sm:$0xff] }
  0x2c   :  { %405 = vmatprep.subr.bf16.mxu1 %v404_v15  ;;  %v388_v24 = vpack.c.bf16 %v59_v22, %v58_v21  ;;  %v392_v27 = vpack.c.bf16 %v61_v26, %v60_v25  ;;  %v62_v28 = vld [vmem:[#allocation2 + $0x60] sm:$0xff]  ;;  %v64_v31 = vld [vmem:[#allocation2 + $0x70] sm:$0xff]  ;;  %v65_v32 = vld [vmem:[#allocation2 + $0x78] sm:$0xff] }
  0x2d   :  { %379 = vmatpush3.bf16.msra.mxu0 %v376_v5  ;;  %407 = vmatpush3.bf16.msra.mxu1 %v404_v15  ;;  %v396_v30 = vpack.c.bf16 %v63_v29, %v62_v28  ;;  %v400_v33 = vpack.c.bf16 %v65_v32, %v64_v31  ;;  %v49_v34 = vld [vmem:[%s568_s0 + $0x8] sm:$0xff]  ;;  %v164_v35 = vld [vmem:[#allocation4 + $0x30] sm:$0xff]  ;;  %v165_v36 = vld [vmem:[#allocation4 + $0x38] sm:$0xff] }
  0x2e   :  { %381 = vmatprep.subr.bf16.mxu0 %v380_v8  ;;  %409 = vmatprep.subr.bf16.mxu1 %v408_v17  ;;  %v416_v37 = vpack.c.bf16 %v165_v36, %v164_v35  ;;  %v166_v38 = vld [vmem:[#allocation4 + $0x40] sm:$0xff]  ;;  %v167_v39 = vld [vmem:[#allocation4 + $0x48] sm:$0xff]  ;;  %v168_v41 = vld [vmem:[#allocation4 + $0x50] sm:$0xff] }
  0x2f   :  { %v420_v40 = vpack.c.bf16 %v167_v39, %v166_v38  ;;  %v169_v42 = vld [vmem:[#allocation4 + $0x58] sm:$0xff]  ;;  %v170_v44 = vld [vmem:[#allocation4 + $0x60] sm:$0xff]  ;;  %v171_v45 = vld [vmem:[#allocation4 + $0x68] sm:$0xff] }
  0x30   :  { %v424_v43 = vpack.c.bf16 %v169_v42, %v168_v41  ;;  %v428_v46 = vpack.c.bf16 %v171_v45, %v170_v44  ;;  %v172_v47 = vld [vmem:[#allocation4 + $0x70] sm:$0xff]  ;;  %v173_v48 = vld [vmem:[#allocation4 + $0x78] sm:$0xff]  ;;  %v264_v50 = vld [vmem:[%s570_s2] ss:$0 sm:$0xff] }
  0x31   :  { %383 = vmatpush3.bf16.msra.mxu0 %v380_v8  ;;  %411 = vmatpush3.bf16.msra.mxu1 %v408_v17  ;;  %v432_v49 = vpack.c.bf16 %v173_v48, %v172_v47  ;;  %v265_v1 = vld [vmem:[%s572_s4] ss:$0 sm:$0xff] }
  0x32   :  { %385 = vmatprep.subr.bf16.mxu0 %v384_v20  ;;  %413 = vmatprep.subr.bf16.mxu1 %v412_v23 }
  0x35   :  { %387 = vmatpush3.bf16.msra.mxu0 %v384_v20  ;;  %415 = vmatpush3.bf16.msra.mxu1 %v412_v23 }
  0x36   :  { %389 = vmatprep.subr.bf16.mxu0 %v388_v24  ;;  %417 = vmatprep.subr.bf16.mxu1 %v416_v37 }
  0x39   :  { %391 = vmatpush3.bf16.msra.mxu0 %v388_v24  ;;  %419 = vmatpush3.bf16.msra.mxu1 %v416_v37 }
  0x3a   :  { %393 = vmatprep.subr.bf16.mxu0 %v392_v27  ;;  %421 = vmatprep.subr.bf16.mxu1 %v420_v40 }
  0x3d   :  { %395 = vmatpush3.bf16.msra.mxu0 %v392_v27  ;;  %423 = vmatpush3.bf16.msra.mxu1 %v420_v40 }
  0x3e   :  { %397 = vmatprep.subr.bf16.mxu0 %v396_v30  ;;  %425 = vmatprep.subr.bf16.mxu1 %v424_v43 }
  0x41   :  { %399 = vmatpush3.bf16.msra.mxu0 %v396_v30  ;;  %427 = vmatpush3.bf16.msra.mxu1 %v424_v43 }
  0x42   :  { %401 = vmatprep.subr.bf16.mxu0 %v400_v33  ;;  %429 = vmatprep.subr.bf16.mxu1 %v428_v46 }
  0x45   :  { %403 = vmatpush3.bf16.msra.mxu0 %v400_v33  ;;  %431 = vmatpush3.bf16.msra.mxu1 %v428_v46 }
  0x46   :  { %433 = vmatprep.subr.bf16.mxu1 %v432_v49 }
  0x48   :  { %335 = vmatmul.mubr.f32.vlgmr.msra.gmra.mrb[0].mxu0 %v49_v34 }
  0x49   :  { %435 = vmatpush3.bf16.msra.mxu1 %v432_v49 }
 0x11b   :  { %v336_v51 = vpop.f32.mrb[0].mxu0 }
 0x11c   :  { %v145_v52 = vadd.f32 %v336_v51, %v264_v50  ;;  %v139_v53 = vpop.f32.mrb[1].mxu0 }
 0x11d   :  { %v140_v54 = vadd.f32 %v264_v50, %v139_v53 }
 0x11e   :  { %v151_v55 = vmul.f32 0.70710677, %v145_v52  ;;  %v149_v62 = vmul.f32 0.5, %v145_v52 }
 0x11f   :  { %v150_v56 = vmul.f32 0.70710677, %v140_v54  ;;  %v148_v60 = vmul.f32 0.5, %v140_v54 }
 0x120   :  { %440 = verf.f32 %v151_v55 }
 0x121   :  { %442 = verf.f32 %v150_v56 }
 0x12a   :  { %v441_v57 = vpop.eup %440 }
 0x12b   :  { %v443_v58 = vpop.eup %442  ;;  %v155_v59 = vadd.f32 1.0, %v441_v57 }
 0x12c   :  { %v154_v61 = vadd.f32 1.0, %v443_v58 }
 0x12d   :  { %v157_v0 = vmul.f32 %v155_v59, %v149_v62 }
 0x12e   :  { %v156_v63 = vmul.f32 %v154_v61, %v148_v60 }
 0x130   :  { %369 = vmatprep.mubr.f32.mxu1 %v156_v63 }
 0x131   :  { %370 = vmatmul.mubr.f32.vlgmr.msra.gmra.mrb[0].mxu1 %v157_v0 }
 0x204   :  { %v371_v2 = vpop.f32.mrb[0].mxu1 }
 0x205   :  { %v253_v3 = vadd.f32 %v371_v2, %v265_v1  ;;  %v247_v4 = vpop.f32.mrb[1].mxu1 }
 0x206   :  { %v248_v5 = vadd.f32 %v265_v1, %v247_v4 }
 0x207   :  { %257 = vst [vmem:[%s573_s5 + $0x8] sm:$0xff] %v253_v3 }
 0x208   :  { %256 = vst [vmem:[%s573_s5] sm:$0xff] %v248_v5 }
 0x209   :  { %262 = vsyncpa [#allocation3], 1 }
 0x20a   :  { %263 = vsyncpa [#allocation5], 1 }

</bundles_post_ra>
